<compile_context>
chip_gen: v7x
topology: tpu7x:2x2x1
jax: 0.10.0
libtpu: 0.0.40
codegen_flags: <defaults>
</compile_context>

<pallas_src>
import functools

import jax
import jax.numpy as jnp
from jax.experimental import pallas as pl
from jax.experimental.pallas import tpu as pltpu

_LANE = 128       # lane width (last dim)
_BF16_SUBLANE = 16  # bf16 packed sublane pair
_NEG_SLOPE = 0.2


def _round_up(x, m):
    return (x + m - 1) // m * m


def _pad_to(a, shape, dtype):
    a = a.astype(dtype)
    return jnp.pad(a, [(0, t - s) for s, t in zip(a.shape, shape)])


def _vmem_capacity_bytes():
    """Physical per-core VMEM, with a conservative (v7x) fallback."""
    try:
        info = pltpu.get_tpu_info()
        cap = int(getattr(info, "vmem_capacity_bytes"))
        if cap > 0:
            return cap
    except Exception:
        pass
    return 64 << 20


def _decoder_kernel(x_ref, w1_ref, b1_ref, w2_ref, b2_ref, w3_ref, b3_ref, out_ref):
    """One batch tile of the fused decoder MLP.

    x_ref  : (tb, Lk)  bf16   VMEM
    w1_ref : (Lk, Hp)  bf16
    b1_ref : (1, Hp)   f32
    w2_ref : (Hp, Hp)  bf16
    b2_ref : (1, Hp)   f32
    w3_ref : (Hp, Op)  bf16
    b3_ref : (1, Op)   f32
    out_ref: (tb, Op)  f32
    """
    def leaky(v):  # f32 activation math (safe on v5e's f32-only VPU)
        return jnp.where(v > 0, v, _NEG_SLOPE * v)

    x = x_ref[...]
    h = jnp.dot(x, w1_ref[...], preferred_element_type=jnp.float32) + b1_ref[...]
    h = leaky(h)
    h = jnp.dot(h.astype(jnp.bfloat16), w2_ref[...],
                preferred_element_type=jnp.float32) + b2_ref[...]
    h = leaky(h)
    y = jnp.dot(h.astype(jnp.bfloat16), w3_ref[...],
                preferred_element_type=jnp.float32) + b3_ref[...]
    out_ref[...] = jax.nn.sigmoid(y).astype(out_ref.dtype)


def prepare_decoder_params(w1, b1, w2, b2, w3, b3):
    """One-time (per parameter set) padding + bf16 cast, hoisted out of the
    per-call path so the forward pass never re-reads/re-writes the weights in XLA.

    Padding is mathematically inert: zero weight rows/cols + zero bias -> 0 through
    LeakyReLU; padded output lanes hold sigmoid(0)=0.5 and are sliced off.
    """
    latent, hidden = w1.shape
    out_dim = w3.shape[1]

    Lk = _round_up(latent, _BF16_SUBLANE)   # small K pad only (NOT 128)
    Hp = _round_up(hidden, _LANE)           # lane-dense hidden
    Op = _round_up(out_dim, _LANE)          # lane-dense output store

    w1p = _pad_to(w1, (Lk, Hp), jnp.bfloat16)
    w2p = _pad_to(w2, (Hp, Hp), jnp.bfloat16)
    w3p = _pad_to(w3, (Hp, Op), jnp.bfloat16)
    b1p = _pad_to(b1.reshape(1, -1), (1, Hp), jnp.float32)
    b2p = _pad_to(b2.reshape(1, -1), (1, Hp), jnp.float32)
    b3p = _pad_to(b3.reshape(1, -1), (1, Op), jnp.float32)
    return w1p, b1p, w2p, b2p, w3p, b3p


def decoder_forward_prepared(x, w1p, b1p, w2p, b2p, w3p, b3p, *,
                             out_dim, block_b=None, single_buffer_params=True):
    """Pallas-backed forward pass using pre-padded / pre-cast parameters.

    x: [B, latent_dim] float32; returns [B, out_dim] float32.
    """
    B, latent = x.shape
    Lk, Hp = w1p.shape
    Op = w3p.shape[1]

    # ---- batch tile: multiple of 16 (bf16 sublane pair), bounded & VMEM-aware ----
    if block_b is None:
        block_b = 512 if Hp < 2048 else 256
    block_b = max(_BF16_SUBLANE, _round_up(block_b, _BF16_SUBLANE))
    block_b = min(block_b, _round_up(B, _BF16_SUBLANE))

    param_bufs = 1 if single_buffer_params else 2

    def vmem_needed(bb):
        weight_bytes = (Lk * Hp + Hp * Hp + Hp * Op) * 2 * param_bufs
        bias_bytes = (2 * Hp + Op) * 4 * param_bufs
        io_bytes = 2 * bb * (Lk * 2 + Op * 4)   # double-buffered x / out tiles
        scratch_bytes = 3 * bb * Hp * 4          # live f32 intermediates headroom
        return weight_bytes + bias_bytes + io_bytes + scratch_bytes

    vmem_cap = int(0.8 * _vmem_capacity_bytes())   # leave compiler scratch headroom
    while block_b > _BF16_SUBLANE and vmem_needed(block_b) > vmem_cap:
        block_b = max(_BF16_SUBLANE, _round_up(block_b // 2, _BF16_SUBLANE))

    Bp = _round_up(B, block_b)
    grid = (Bp // block_b,)

    vmem_limit = int(min(max(vmem_needed(block_b) + (4 << 20), 16 << 20), vmem_cap))

    # Only shard the batch axis across cores when compute-bound; for small
    # (weight-bandwidth-bound) batches keep it "arbitrary" so weights are only
    # resident in one core's VMEM.
    compute_bound = Bp >= 2048
    semantics = ("parallel",) if (grid[0] > 1 and compute_bound) else ("arbitrary",)

    # Pad only the activation: batch rows + small latent pad to Lk (<=15 lanes).
    xp = _pad_to(x, (Bp, Lk), jnp.bfloat16)

    # Grid-invariant parameters: single-buffer (default double-buffering would waste
    # VMEM on tensors whose block index never changes).
    def param_spec(shape):
        idx = lambda i, _n=len(shape): (0,) * _n
        if single_buffer_params:
            return pl.BlockSpec(shape, idx, pipeline_mode=pl.Buffered(1))
        return pl.BlockSpec(shape, idx)

    cost = pl.CostEstimate(
        flops=2 * Bp * (Lk * Hp + Hp * Hp + Hp * Op),
        transcendentals=Bp * Op,  # sigmoid
        bytes_accessed=(xp.size * 2
                        + (w1p.size + w2p.size + w3p.size) * 2
                        + (b1p.size + b2p.size + b3p.size) * 4
                        + Bp * Op * 4),
    )

    out_padded = pl.pallas_call(
        _decoder_kernel,
        out_shape=jax.ShapeDtypeStruct((Bp, Op), jnp.float32),
        grid_spec=pltpu.PrefetchScalarGridSpec(
            num_scalar_prefetch=0,
            grid=grid,
            in_specs=[
                pl.BlockSpec((block_b, Lk), lambda i: (i, 0)),   # x tile (pipelined)
                param_spec((Lk, Hp)),                            # w1
                param_spec((1, Hp)),                             # b1
                param_spec((Hp, Hp)),                            # w2
                param_spec((1, Hp)),                             # b2
                param_spec((Hp, Op)),                            # w3
                param_spec((1, Op)),                             # b3
            ],
            out_specs=pl.BlockSpec((block_b, Op), lambda i: (i, 0)),
        ),
        compiler_params=pltpu.CompilerParams(
            dimension_semantics=semantics,
            vmem_limit_bytes=vmem_limit,
        ),
        cost_estimate=cost,
    )(xp, w1p, b1p, w2p, b2p, w3p, b3p)

    # Strip batch padding and inert output lanes (sigmoid(0)=0.5 there).
    return out_padded[:B, :out_dim]


def _reference_forward(x, w1, b1, w2, b2, w3, b3, *, matmul_dtype=jnp.float32):
    """Pure-JAX reference matching the PyTorch module semantics."""
    leaky = lambda v: jnp.where(v > 0, v, _NEG_SLOPE * v)

    def lin(a, w, b):
        return jnp.dot(a.astype(matmul_dtype), w.astype(matmul_dtype),
                       preferred_element_type=jnp.float32) + b

    h = leaky(lin(x, w1, b1))
    h = leaky(lin(h, w2, b2))
    return jax.nn.sigmoid(lin(h, w3, b3))


def _init_params(key, latent_dim, hidden_dim, output_dim):
    """Deterministic synthetic parameters (uniform, like torch's default Linear init)."""
    ks = jax.random.split(key, 6)

    def lin(kw, kb, fan_in, fan_out):
        bound = 1.0 / jnp.sqrt(fan_in)
        # stored as [in, out] so kernel does x @ W (== x @ W_pt.T in torch terms)
        w = jax.random.uniform(kw, (fan_in, fan_out), jnp.float32, -bound, bound)
        b = jax.random.uniform(kb, (fan_out,), jnp.float32, -bound, bound)
        return w, b

    w1, b1 = lin(ks[0], ks[1], latent_dim, hidden_dim)
    w2, b2 = lin(ks[2], ks[3], hidden_dim, hidden_dim)
    w3, b3 = lin(ks[4], ks[5], hidden_dim, output_dim)
    return w1, b1, w2, b2, w3, b3


if __name__ == "__main__":
    latent_dim, hidden_dim, output_dim = 16, 32, 64
    batch = 8

    key = jax.random.PRNGKey(0)
    k_x, k_p = jax.random.split(key)

    x = jax.random.normal(k_x, (batch, latent_dim), dtype=jnp.float32)
    params = _init_params(k_p, latent_dim, hidden_dim, output_dim)

    # One-time weight prep (pad + bf16 cast), hoisted out of the per-call path.
    prepared = jax.block_until_ready(prepare_decoder_params(*params))

    fwd = jax.jit(functools.partial(decoder_forward_prepared, out_dim=output_dim))
    try:
        out = jax.block_until_ready(fwd(x, *prepared))
    except Exception:
        # Fallback if this JAX build rejects single-buffered (Buffered(1)) param specs.
        fwd = jax.jit(functools.partial(decoder_forward_prepared, out_dim=output_dim,
                                        single_buffer_params=False))
        out = jax.block_until_ready(fwd(x, *prepared))

    ref_bf16 = _reference_forward(x, *params, matmul_dtype=jnp.bfloat16)  # kernel numerics
    ref_f32 = _reference_forward(x, *params)                              # PyTorch-equivalent f32

    assert out.shape == (batch, output_dim), out.shape
    assert jnp.allclose(out, ref_bf16, atol=5e-3, rtol=5e-3), "mismatch vs bf16-matmul reference"
    assert jnp.allclose(out, ref_f32, atol=5e-2, rtol=5e-2), "mismatch vs f32 reference"

    print("KERNEL_OK")
</pallas_src>

<mosaic_0001>
module attributes {stable_mosaic.version = 11 : i64} {
  func.func @_decoder_kernel(%arg0: i32, %arg1: memref<16x16xbf16, #tpu.memory_space<vmem>>, %arg2: memref<16x128xbf16, #tpu.memory_space<vmem>>, %arg3: memref<1x128xf32, #tpu.memory_space<vmem>>, %arg4: memref<128x128xbf16, #tpu.memory_space<vmem>>, %arg5: memref<1x128xf32, #tpu.memory_space<vmem>>, %arg6: memref<128x128xbf16, #tpu.memory_space<vmem>>, %arg7: memref<1x128xf32, #tpu.memory_space<vmem>>, %arg8: memref<16x128xf32, #tpu.memory_space<vmem>>) attributes {dimension_semantics = [#tpu.dimension_semantics<arbitrary>], iteration_bounds = array<i64: 1>, scalar_prefetch = 0 : i64, scratch_operands = 0 : i64, tpu.core_type = #tpu.core_type<tc>, window_params = [{transform_indices = @transform_0, window_bounds = array<i64: 16, 16>}, {pipeline_mode = #tpu.pipeline_mode<synchronous>, transform_indices = @transform_1, window_bounds = array<i64: 16, 128>}, {pipeline_mode = #tpu.pipeline_mode<synchronous>, transform_indices = @transform_2, window_bounds = array<i64: 1, 128>}, {pipeline_mode = #tpu.pipeline_mode<synchronous>, transform_indices = @transform_3, window_bounds = array<i64: 128, 128>}, {pipeline_mode = #tpu.pipeline_mode<synchronous>, transform_indices = @transform_4, window_bounds = array<i64: 1, 128>}, {pipeline_mode = #tpu.pipeline_mode<synchronous>, transform_indices = @transform_5, window_bounds = array<i64: 128, 128>}, {pipeline_mode = #tpu.pipeline_mode<synchronous>, transform_indices = @transform_6, window_bounds = array<i64: 1, 128>}, {transform_indices = @transform_7, window_bounds = array<i64: 16, 128>}]} {
    %c0 = arith.constant 0 : index
    %c0_0 = arith.constant 0 : index
    %0 = vector.load %arg1[%c0, %c0_0] : memref<16x16xbf16, #tpu.memory_space<vmem>>, vector<16x16xbf16>
    %c0_1 = arith.constant 0 : index
    %c0_2 = arith.constant 0 : index
    %1 = vector.load %arg2[%c0_1, %c0_2] : memref<16x128xbf16, #tpu.memory_space<vmem>>, vector<16x128xbf16>
    %cst = arith.constant dense<0.000000e+00> : vector<16x128xf32>
    %2 = tpu.matmul %0, %1, %cst {dimension_numbers = #tpu.dot_dimension_numbers<[1], [0], [0], [1], [0, 0, 1, 1], [], []>} : vector<16x16xbf16>, vector<16x128xbf16>, vector<16x128xf32> -> vector<16x128xf32>
    %c0_3 = arith.constant 0 : index
    %c0_4 = arith.constant 0 : index
    %3 = vector.load %arg3[%c0_3, %c0_4] : memref<1x128xf32, #tpu.memory_space<vmem>>, vector<1x128xf32>
    %4 = vector.broadcast %3 : vector<1x128xf32> to vector<16x128xf32>
    %5 = arith.addf %2, %4 : vector<16x128xf32>
    %cst_5 = arith.constant 0.000000e+00 : f32
    %6 = vector.broadcast %cst_5 : f32 to vector<16x128xf32>
    %7 = arith.cmpf ogt, %5, %6 : vector<16x128xf32>
    %cst_6 = arith.constant 2.000000e-01 : f32
    %8 = vector.broadcast %cst_6 : f32 to vector<16x128xf32>
    %9 = arith.mulf %8, %5 : vector<16x128xf32>
    %10 = arith.select %7, %5, %9 : vector<16x128xi1>, vector<16x128xf32>
    %11 = arith.truncf %10 : vector<16x128xf32> to vector<16x128xbf16>
    %c0_7 = arith.constant 0 : index
    %c0_8 = arith.constant 0 : index
    %12 = vector.load %arg4[%c0_7, %c0_8] : memref<128x128xbf16, #tpu.memory_space<vmem>>, vector<128x128xbf16>
    %cst_9 = arith.constant dense<0.000000e+00> : vector<16x128xf32>
    %13 = tpu.matmul %11, %12, %cst_9 {dimension_numbers = #tpu.dot_dimension_numbers<[1], [0], [0], [1], [0, 0, 1, 1], [], []>} : vector<16x128xbf16>, vector<128x128xbf16>, vector<16x128xf32> -> vector<16x128xf32>
    %c0_10 = arith.constant 0 : index
    %c0_11 = arith.constant 0 : index
    %14 = vector.load %arg5[%c0_10, %c0_11] : memref<1x128xf32, #tpu.memory_space<vmem>>, vector<1x128xf32>
    %15 = vector.broadcast %14 : vector<1x128xf32> to vector<16x128xf32>
    %16 = arith.addf %13, %15 : vector<16x128xf32>
    %cst_12 = arith.constant 0.000000e+00 : f32
    %17 = vector.broadcast %cst_12 : f32 to vector<16x128xf32>
    %18 = arith.cmpf ogt, %16, %17 : vector<16x128xf32>
    %cst_13 = arith.constant 2.000000e-01 : f32
    %19 = vector.broadcast %cst_13 : f32 to vector<16x128xf32>
    %20 = arith.mulf %19, %16 : vector<16x128xf32>
    %21 = arith.select %18, %16, %20 : vector<16x128xi1>, vector<16x128xf32>
    %22 = arith.truncf %21 : vector<16x128xf32> to vector<16x128xbf16>
    %c0_14 = arith.constant 0 : index
    %c0_15 = arith.constant 0 : index
    %23 = vector.load %arg6[%c0_14, %c0_15] : memref<128x128xbf16, #tpu.memory_space<vmem>>, vector<128x128xbf16>
    %cst_16 = arith.constant dense<0.000000e+00> : vector<16x128xf32>
    %24 = tpu.matmul %22, %23, %cst_16 {dimension_numbers = #tpu.dot_dimension_numbers<[1], [0], [0], [1], [0, 0, 1, 1], [], []>} : vector<16x128xbf16>, vector<128x128xbf16>, vector<16x128xf32> -> vector<16x128xf32>
    %c0_17 = arith.constant 0 : index
    %c0_18 = arith.constant 0 : index
    %25 = vector.load %arg7[%c0_17, %c0_18] : memref<1x128xf32, #tpu.memory_space<vmem>>, vector<1x128xf32>
    %26 = vector.broadcast %25 : vector<1x128xf32> to vector<16x128xf32>
    %27 = arith.addf %24, %26 : vector<16x128xf32>
    %28 = arith.negf %27 : vector<16x128xf32>
    %29 = math.exp %28 : vector<16x128xf32>
    %cst_19 = arith.constant 1.000000e+00 : f32
    %30 = vector.broadcast %cst_19 : f32 to vector<16x128xf32>
    %31 = arith.addf %30, %29 : vector<16x128xf32>
    %32 = arith.divf %30, %31 : vector<16x128xf32>
    %c0_20 = arith.constant 0 : index
    %c0_21 = arith.constant 0 : index
    %33 = vector.load %arg8[%c0_20, %c0_21] : memref<16x128xf32, #tpu.memory_space<vmem>>, vector<16x128xf32>
    tpu.vector_store %arg8[%c0_20, %c0_21], %32 {strides = array<i32>} : memref<16x128xf32, #tpu.memory_space<vmem>>, vector<16x128xf32>,
    return
  }
  func.func @transform_0(%arg0: i32) -> (i32, i32) {
    %c0_i32 = arith.constant 0 : i32
    %c0_i32_0 = arith.constant 0 : i32
    return %arg0, %c0_i32 : i32, i32
  }
  func.func @transform_1(%arg0: i32) -> (i32, i32) {
    %c0_i32 = arith.constant 0 : i32
    %c0_i32_0 = arith.constant 0 : i32
    %c0_i32_1 = arith.constant 0 : i32
    return %c0_i32, %c0_i32_0 : i32, i32
  }
  func.func @transform_2(%arg0: i32) -> (i32, i32) {
    %c0_i32 = arith.constant 0 : i32
    %c0_i32_0 = arith.constant 0 : i32
    %c0_i32_1 = arith.constant 0 : i32
    return %c0_i32, %c0_i32_0 : i32, i32
  }
  func.func @transform_3(%arg0: i32) -> (i32, i32) {
    %c0_i32 = arith.constant 0 : i32
    %c0_i32_0 = arith.constant 0 : i32
    %c0_i32_1 = arith.constant 0 : i32
    return %c0_i32, %c0_i32_0 : i32, i32
  }
  func.func @transform_4(%arg0: i32) -> (i32, i32) {
    %c0_i32 = arith.constant 0 : i32
    %c0_i32_0 = arith.constant 0 : i32
    %c0_i32_1 = arith.constant 0 : i32
    return %c0_i32, %c0_i32_0 : i32, i32
  }
  func.func @transform_5(%arg0: i32) -> (i32, i32) {
    %c0_i32 = arith.constant 0 : i32
    %c0_i32_0 = arith.constant 0 : i32
    %c0_i32_1 = arith.constant 0 : i32
    return %c0_i32, %c0_i32_0 : i32, i32
  }
  func.func @transform_6(%arg0: i32) -> (i32, i32) {
    %c0_i32 = arith.constant 0 : i32
    %c0_i32_0 = arith.constant 0 : i32
    %c0_i32_1 = arith.constant 0 : i32
    return %c0_i32, %c0_i32_0 : i32, i32
  }
  func.func @transform_7(%arg0: i32) -> (i32, i32) {
    %c0_i32 = arith.constant 0 : i32
    %c0_i32_0 = arith.constant 0 : i32
    return %arg0, %c0_i32 : i32, i32
  }
}

module attributes {stable_mosaic.version = 11 : i64} {
  func.func @_decoder_kernel(%arg0: i32, %arg1: memref<16x16xbf16, #tpu.memory_space<vmem>>, %arg2: memref<16x128xbf16, #tpu.memory_space<vmem>>, %arg3: memref<1x128xf32, #tpu.memory_space<vmem>>, %arg4: memref<128x128xbf16, #tpu.memory_space<vmem>>, %arg5: memref<1x128xf32, #tpu.memory_space<vmem>>, %arg6: memref<128x128xbf16, #tpu.memory_space<vmem>>, %arg7: memref<1x128xf32, #tpu.memory_space<vmem>>, %arg8: memref<16x128xf32, #tpu.memory_space<vmem>>) attributes {dimension_semantics = [#tpu.dimension_semantics<arbitrary>], iteration_bounds = array<i64: 1>, scalar_prefetch = 0 : i64, scratch_operands = 0 : i64, tpu.core_type = #tpu.core_type<tc>, window_params = [{transform_indices = @transform_0, window_bounds = array<i64: 16, 16>}, {pipeline_mode = #tpu.pipeline_mode<synchronous>, transform_indices = @transform_1, window_bounds = array<i64: 16, 128>}, {pipeline_mode = #tpu.pipeline_mode<synchronous>, transform_indices = @transform_2, window_bounds = array<i64: 1, 128>}, {pipeline_mode = #tpu.pipeline_mode<synchronous>, transform_indices = @transform_3, window_bounds = array<i64: 128, 128>}, {pipeline_mode = #tpu.pipeline_mode<synchronous>, transform_indices = @transform_4, window_bounds = array<i64: 1, 128>}, {pipeline_mode = #tpu.pipeline_mode<synchronous>, transform_indices = @transform_5, window_bounds = array<i64: 128, 128>}, {pipeline_mode = #tpu.pipeline_mode<synchronous>, transform_indices = @transform_6, window_bounds = array<i64: 1, 128>}, {transform_indices = @transform_7, window_bounds = array<i64: 16, 128>}]} {
    %c0 = arith.constant 0 : index
    %c0_0 = arith.constant 0 : index
    %0 = vector.load %arg1[%c0, %c0_0] : memref<16x16xbf16, #tpu.memory_space<vmem>>, vector<16x16xbf16>
    %c0_1 = arith.constant 0 : index
    %c0_2 = arith.constant 0 : index
    %1 = vector.load %arg2[%c0_1, %c0_2] : memref<16x128xbf16, #tpu.memory_space<vmem>>, vector<16x128xbf16>
    %cst = arith.constant dense<0.000000e+00> : vector<16x128xf32>
    %2 = tpu.matmul %0, %1, %cst {dimension_numbers = #tpu.dot_dimension_numbers<[1], [0], [0], [1], [0, 0, 1, 1], [], []>} : vector<16x16xbf16>, vector<16x128xbf16>, vector<16x128xf32> -> vector<16x128xf32>
    %c0_3 = arith.constant 0 : index
    %c0_4 = arith.constant 0 : index
    %3 = vector.load %arg3[%c0_3, %c0_4] : memref<1x128xf32, #tpu.memory_space<vmem>>, vector<1x128xf32>
    %4 = vector.broadcast %3 : vector<1x128xf32> to vector<16x128xf32>
    %5 = arith.addf %2, %4 : vector<16x128xf32>
    %cst_5 = arith.constant 0.000000e+00 : f32
    %6 = vector.broadcast %cst_5 : f32 to vector<16x128xf32>
    %7 = arith.cmpf ogt, %5, %6 : vector<16x128xf32>
    %cst_6 = arith.constant 2.000000e-01 : f32
    %8 = vector.broadcast %cst_6 : f32 to vector<16x128xf32>
    %9 = arith.mulf %8, %5 : vector<16x128xf32>
    %10 = arith.select %7, %5, %9 : vector<16x128xi1>, vector<16x128xf32>
    %11 = arith.truncf %10 : vector<16x128xf32> to vector<16x128xbf16>
    %c0_7 = arith.constant 0 : index
    %c0_8 = arith.constant 0 : index
    %12 = vector.load %arg4[%c0_7, %c0_8] : memref<128x128xbf16, #tpu.memory_space<vmem>>, vector<128x128xbf16>
    %cst_9 = arith.constant dense<0.000000e+00> : vector<16x128xf32>
    %13 = tpu.matmul %11, %12, %cst_9 {dimension_numbers = #tpu.dot_dimension_numbers<[1], [0], [0], [1], [0, 0, 1, 1], [], []>} : vector<16x128xbf16>, vector<128x128xbf16>, vector<16x128xf32> -> vector<16x128xf32>
    %c0_10 = arith.constant 0 : index
    %c0_11 = arith.constant 0 : index
    %14 = vector.load %arg5[%c0_10, %c0_11] : memref<1x128xf32, #tpu.memory_space<vmem>>, vector<1x128xf32>
    %15 = vector.broadcast %14 : vector<1x128xf32> to vector<16x128xf32>
    %16 = arith.addf %13, %15 : vector<16x128xf32>
    %cst_12 = arith.constant 0.000000e+00 : f32
    %17 = vector.broadcast %cst_12 : f32 to vector<16x128xf32>
    %18 = arith.cmpf ogt, %16, %17 : vector<16x128xf32>
    %cst_13 = arith.constant 2.000000e-01 : f32
    %19 = vector.broadcast %cst_13 : f32 to vector<16x128xf32>
    %20 = arith.mulf %19, %16 : vector<16x128xf32>
    %21 = arith.select %18, %16, %20 : vector<16x128xi1>, vector<16x128xf32>
    %22 = arith.truncf %21 : vector<16x128xf32> to vector<16x128xbf16>
    %c0_14 = arith.constant 0 : index
    %c0_15 = arith.constant 0 : index
    %23 = vector.load %arg6[%c0_14, %c0_15] : memref<128x128xbf16, #tpu.memory_space<vmem>>, vector<128x128xbf16>
    %cst_16 = arith.constant dense<0.000000e+00> : vector<16x128xf32>
    %24 = tpu.matmul %22, %23, %cst_16 {dimension_numbers = #tpu.dot_dimension_numbers<[1], [0], [0], [1], [0, 0, 1, 1], [], []>} : vector<16x128xbf16>, vector<128x128xbf16>, vector<16x128xf32> -> vector<16x128xf32>
    %c0_17 = arith.constant 0 : index
    %c0_18 = arith.constant 0 : index
    %25 = vector.load %arg7[%c0_17, %c0_18] : memref<1x128xf32, #tpu.memory_space<vmem>>, vector<1x128xf32>
    %26 = vector.broadcast %25 : vector<1x128xf32> to vector<16x128xf32>
    %27 = arith.addf %24, %26 : vector<16x128xf32>
    %28 = arith.negf %27 : vector<16x128xf32>
    %29 = math.exp %28 : vector<16x128xf32>
    %cst_19 = arith.constant 1.000000e+00 : f32
    %30 = vector.broadcast %cst_19 : f32 to vector<16x128xf32>
    %31 = arith.addf %30, %29 : vector<16x128xf32>
    %32 = arith.divf %30, %31 : vector<16x128xf32>
    %c0_20 = arith.constant 0 : index
    %c0_21 = arith.constant 0 : index
    %33 = vector.load %arg8[%c0_20, %c0_21] : memref<16x128xf32, #tpu.memory_space<vmem>>, vector<16x128xf32>
    tpu.vector_store %arg8[%c0_20, %c0_21], %32 {strides = array<i32>} : memref<16x128xf32, #tpu.memory_space<vmem>>, vector<16x128xf32>,
    return
  }
  func.func @transform_0(%arg0: i32) -> (i32, i32) {
    %c0_i32 = arith.constant 0 : i32
    %c0_i32_0 = arith.constant 0 : i32
    return %arg0, %c0_i32 : i32, i32
  }
  func.func @transform_1(%arg0: i32) -> (i32, i32) {
    %c0_i32 = arith.constant 0 : i32
    %c0_i32_0 = arith.constant 0 : i32
    %c0_i32_1 = arith.constant 0 : i32
    return %c0_i32, %c0_i32_0 : i32, i32
  }
  func.func @transform_2(%arg0: i32) -> (i32, i32) {
    %c0_i32 = arith.constant 0 : i32
    %c0_i32_0 = arith.constant 0 : i32
    %c0_i32_1 = arith.constant 0 : i32
    return %c0_i32, %c0_i32_0 : i32, i32
  }
  func.func @transform_3(%arg0: i32) -> (i32, i32) {
    %c0_i32 = arith.constant 0 : i32
    %c0_i32_0 = arith.constant 0 : i32
    %c0_i32_1 = arith.constant 0 : i32
    return %c0_i32, %c0_i32_0 : i32, i32
  }
  func.func @transform_4(%arg0: i32) -> (i32, i32) {
    %c0_i32 = arith.constant 0 : i32
    %c0_i32_0 = arith.constant 0 : i32
    %c0_i32_1 = arith.constant 0 : i32
    return %c0_i32, %c0_i32_0 : i32, i32
  }
  func.func @transform_5(%arg0: i32) -> (i32, i32) {
    %c0_i32 = arith.constant 0 : i32
    %c0_i32_0 = arith.constant 0 : i32
    %c0_i32_1 = arith.constant 0 : i32
    return %c0_i32, %c0_i32_0 : i32, i32
  }
  func.func @transform_6(%arg0: i32) -> (i32, i32) {
    %c0_i32 = arith.constant 0 : i32
    %c0_i32_0 = arith.constant 0 : i32
    %c0_i32_1 = arith.constant 0 : i32
    return %c0_i32, %c0_i32_0 : i32, i32
  }
  func.func @transform_7(%arg0: i32) -> (i32, i32) {
    %c0_i32 = arith.constant 0 : i32
    %c0_i32_0 = arith.constant 0 : i32
    return %arg0, %c0_i32 : i32, i32
  }
}

</mosaic_0001>

<bundles_post_ra>
// kernel: decoder_forward_prepared.1
= control target key start
LH: loop header
LB: loop body
LE: loop exit
PB: predicated region body
PF: predicated region fallthrough
CT: control target
= control target key end

     0   :  { %12 = vsyncpa [#allocation3], 0  ;;  %s661_s0 = inlined_call_operand.vmem [shape: bf16[16,16], index: 0, kind: input, shape index: {}]   ;;  %s662_s1 = inlined_call_operand.vmem [shape: bf16[16,128], index: 1, kind: input, shape index: {}]   ;;  %s663_s2 = inlined_call_operand.vmem [shape: f32[1,128], index: 2, kind: input, shape index: {}]   ;;  %s664_s3 = inlined_call_operand.hbm [shape: bf16[128,128], index: 3, kind: input, shape index: {}]   ;;  %s665_s4 = inlined_call_operand.vmem [shape: f32[1,128], index: 4, kind: input, shape index: {}]   ;;  %s666_s5 = inlined_call_operand.hbm [shape: bf16[128,128], index: 5, kind: input, shape index: {}]   ;;  %s667_s6 = inlined_call_operand.vmem [shape: f32[1,128], index: 6, kind: input, shape index: {}]   ;;  %s668_s7 = inlined_call_operand.vmem [shape: f32[16,128], index: 7, kind: output, shape index: {}]  }
   0x1   :  { %13 = vsyncpa [#allocation5], 0  ;;  %s550_s24 = smov [#allocation2]   ;;  %s502_s28 = scalar_lea.hbm %s664_s3, 1024 }
   0x2   :  { %s25_s25 = sshll.u32 %s550_s24, 4  ;;  %p503_p0 = scmp.ne.s32.totalorder %s664_s3, %s502_s28  ;;  %s26_s25 = int_to_ptr.vmem [resolvable:$true] %s25_s25 }
   0x3   :  { %p506_p1 = scmp.lt.u32.totalorder %s502_s28, %s664_s3 }
   0x5   :  { %p508_p2 = pnand %p506_p1, %p503_p0 }
   0x7   :  { %511 = shalt.err (!%p508_p2)
}
   0x8   :  { %s512_s10 = scalar_lea.vmem %s26_s25, 1024  ;;  %p517_p4 = scmp.lt.s32.totalorder %s26_s25, %s26_s25 }
   0x9   :  { %p513_p3 = scmp.ne.s32.totalorder %s26_s25, %s512_s10  ;;  %p518_p5 = scmp.lt.s32.totalorder %s512_s10, %s512_s10 }
   0xb   :  { %p519_p6 = por %p518_p5, %p517_p4 }
   0xd   :  { %p520_p7 = pnand %p519_p6, %p513_p3 }
   0xf   :  { %523 = shalt.err (!%p520_p7)
}
  0x10   :  { %s551_s11 = smov 64   ;;  %s552_s12 = smov 4  }
  0x11   :  { %31 = dma.hbm_to_vmem [thread:$0]  %s664_s3, 1024, %s26_s25, [#allocation3], %s551_s11, %s551_s11, %s552_s12  }
  0x12   :  { %s553_s15 = smov [#allocation4]   ;;  %s524_s19 = scalar_lea.hbm %s666_s5, 1024 }
  0x13   :  { %s39_s16 = sshll.u32 %s553_s15, 4  ;;  %p525_p8 = scmp.ne.s32.totalorder %s666_s5, %s524_s19  ;;  %s40_s16 = int_to_ptr.vmem [resolvable:$true] %s39_s16 }
  0x14   :  { %p528_p9 = scmp.lt.u32.totalorder %s524_s19, %s666_s5 }
  0x16   :  { %p530_p10 = pnand %p528_p9, %p525_p8 }
  0x18   :  { %533 = shalt.err (!%p530_p10)
}
  0x19   :  { %s534_s24 = scalar_lea.vmem %s40_s16, 1024  ;;  %p539_p12 = scmp.lt.s32.totalorder %s40_s16, %s40_s16 }
  0x1a   :  { %p535_p11 = scmp.ne.s32.totalorder %s40_s16, %s534_s24  ;;  %p540_p13 = scmp.lt.s32.totalorder %s534_s24, %s534_s24 }
  0x1c   :  { %p541_p0 = por %p540_p13, %p539_p12 }
  0x1e   :  { %p542_p1 = pnand %p541_p0, %p535_p11 }
  0x20   :  { %545 = shalt.err (!%p542_p1)
}
  0x21   :  { %45 = dma.hbm_to_vmem [thread:$0]  %s666_s5, 1024, %s40_s16, [#allocation5], %s551_s11, %s551_s11, %s552_s12  }
  0x22   :  { %546 = dma.done.wait [#allocation3], 1024  }
  0x23   :  { %547 = vsyncadd [#allocation3], 4294966272 }
  0x24   :  { %548 = dma.done.wait [#allocation5], 1024  }
  0x25   :  { %549 = vsyncadd [#allocation5], 4294966272  ;;  %v554_v0 = vmov 0.0   ;;  %vm555_vm0 = vmmov 0   ;;  %v476_v1 = vld [vmem:[%s662_s1] sm:$0xff]   ;;  %vm77_vm1 = vcmask 130048  }
  0x26   :  { %424 = vmatprep.subr.bf16.mxu0 %v554_v0  ;;  %426 = vmatprep.mubr.msk.bf16.mxu0 %vm555_vm0, %v554_v0  ;;  %v477_v2 = vld [vmem:[%s661_s0] sm:$0xff]   ;;  %v479_v4 = vld [vmem:[#allocation2 + $0x8] sm:$0xff]   ;;  %v480_v5 = vld [vmem:[#allocation2 + $0x10] sm:$0xff]  }
  0x27   :  { %430 = vmatprep.subr.bf16.mxu1 %v554_v0  ;;  %446 = vmatprep.mubr.msk.bf16.mxu1 %vm555_vm0, %v554_v0  ;;  %v478_v3 = vld [vmem:[#allocation2] sm:$0xff]   ;;  %v481_v6 = vld [vmem:[#allocation2 + $0x18] sm:$0xff]   ;;  %v483_v8 = vld [vmem:[#allocation2 + $0x28] sm:$0xff]  }
  0x28   :  { %425 = vmatpush3.bf16.msra.mxu0 %v476_v1  ;;  %431 = vmatpush3.bf16.msra.mxu1 %v478_v3  ;;  %v482_v7 = vld [vmem:[#allocation2 + $0x20] sm:$0xff]   ;;  %v484_v9 = vld [vmem:[#allocation2 + $0x30] sm:$0xff]   ;;  %v485_v10 = vld [vmem:[#allocation2 + $0x38] sm:$0xff]  }
  0x29   :  { %450 = vmatprep.subr.bf16.mxu0 %v554_v0  ;;  %432 = vmatprep.subr.bf16.mxu1 %v554_v0  ;;  %v486_v11 = vld [vmem:[#allocation4] sm:$0xff]   ;;  %v487_v12 = vld [vmem:[#allocation4 + $0x8] sm:$0xff]   ;;  %v488_v13 = vld [vmem:[#allocation4 + $0x10] sm:$0xff]  }
  0x2a   :  { %v489_v14 = vld [vmem:[#allocation4 + $0x18] sm:$0xff]   ;;  %v490_v15 = vld [vmem:[#allocation4 + $0x20] sm:$0xff]   ;;  %v491_v16 = vld [vmem:[#allocation4 + $0x28] sm:$0xff]  }
  0x2b   :  { %427 = vmatmul.mubr.msk.bf16.vlgmr.msra.gmra.mrb[0].mxu0 %vm77_vm1, %v477_v2  ;;  %v380_v17 = vld [vmem:[%s663_s2] ss:$0 sm:$0xff]  ;;  %v492_v29 = vld [vmem:[#allocation4 + $0x30] sm:$0xff]   ;;  %v493_v30 = vld [vmem:[#allocation4 + $0x38] sm:$0xff]  }
  0x2c   :  { %466 = vmatprep.mubr.msk.bf16.mxu0 %vm555_vm0, %v554_v0  ;;  %433 = vmatpush3.bf16.msra.mxu1 %v479_v4  ;;  %v384_v31 = vld [vmem:[%s665_s4] ss:$0 sm:$0xff] }
  0x2d   :  { %434 = vmatprep.subr.bf16.mxu1 %v554_v0  ;;  %451 = vmatpush3.bf16.msra.mxu0 %v486_v11  ;;  %v393_v43 = vld [vmem:[%s667_s6] ss:$0 sm:$0xff] }
  0x2e   :  { %452 = vmatprep.subr.bf16.mxu0 %v554_v0 }
  0x30   :  { %435 = vmatpush3.bf16.msra.mxu1 %v480_v5 }
  0x31   :  { %436 = vmatprep.subr.bf16.mxu1 %v554_v0  ;;  %453 = vmatpush3.bf16.msra.mxu0 %v487_v12 }
  0x32   :  { %454 = vmatprep.subr.bf16.mxu0 %v554_v0 }
  0x34   :  { %437 = vmatpush3.bf16.msra.mxu1 %v481_v6 }
  0x35   :  { %438 = vmatprep.subr.bf16.mxu1 %v554_v0  ;;  %455 = vmatpush3.bf16.msra.mxu0 %v488_v13 }
  0x36   :  { %456 = vmatprep.subr.bf16.mxu0 %v554_v0 }
  0x38   :  { %439 = vmatpush3.bf16.msra.mxu1 %v482_v7 }
  0x39   :  { %440 = vmatprep.subr.bf16.mxu1 %v554_v0  ;;  %457 = vmatpush3.bf16.msra.mxu0 %v489_v14 }
  0x3a   :  { %458 = vmatprep.subr.bf16.mxu0 %v554_v0 }
  0x3c   :  { %441 = vmatpush3.bf16.msra.mxu1 %v483_v8 }
  0x3d   :  { %442 = vmatprep.subr.bf16.mxu1 %v554_v0  ;;  %459 = vmatpush3.bf16.msra.mxu0 %v490_v15 }
  0x3e   :  { %460 = vmatprep.subr.bf16.mxu0 %v554_v0 }
  0x40   :  { %443 = vmatpush3.bf16.msra.mxu1 %v484_v9 }
  0x41   :  { %444 = vmatprep.subr.bf16.mxu1 %v554_v0  ;;  %461 = vmatpush3.bf16.msra.mxu0 %v491_v16 }
  0x42   :  { %462 = vmatprep.subr.bf16.mxu0 %v554_v0 }
  0x44   :  { %445 = vmatpush3.bf16.msra.mxu1 %v485_v10 }
  0x45   :  { %463 = vmatpush3.bf16.msra.mxu0 %v492_v29 }
  0x46   :  { %464 = vmatprep.subr.bf16.mxu0 %v554_v0 }
  0x49   :  { %465 = vmatpush3.bf16.msra.mxu0 %v493_v30 }
  0xfe   :  { %v115_v18 = vpop.f32.mrb[0].mxu0 }
  0xff   :  { %v116_v19 = vadd.f32 %v380_v17, %v115_v18  ;;  %v428_v20 = vpop.f32.mrb[1].mxu0 }
 0x100   :  { %v118_v21 = vpop.f32.mrb[2].mxu0 }
 0x101   :  { %v124_v22 = vmul.f32 0.2, %v116_v19  ;;  %v119_v23 = vadd.f32 %v380_v17, %v118_v21  ;;  %v429_v24 = vpop.f32.mrb[3].mxu0  ;;  %vm122_vm2 = vcmp.gt.f32.partialorder %v116_v19, 0.0 }
 0x103   :  { %vm123_vm3 = vcmp.gt.f32.partialorder %v119_v23, 0.0  ;;  %v125_v25 = vmul.f32 0.2, %v119_v23  ;;  %v126_v26 = vsel %vm122_vm2, %v116_v19, %v124_v22 }
 0x105   :  { %v127_v27 = vsel %vm123_vm3, %v119_v23, %v125_v25 }
 0x106   :  { %v128_v28 = vpack.c.bf16 %v127_v27, %v126_v26 }
 0x108   :  { %447 = vmatmul.mubr.bf16.vlgmr.msra.gmra.mrb[0].mxu1 %v128_v28 }
 0x1db   :  { %v234_v32 = vpop.f32.mrb[0].mxu1 }
 0x1dc   :  { %v235_v33 = vadd.f32 %v384_v31, %v234_v32  ;;  %v448_v34 = vpop.f32.mrb[1].mxu1 }
 0x1dd   :  { %v237_v35 = vpop.f32.mrb[2].mxu1 }
 0x1de   :  { %v243_v36 = vmul.f32 0.2, %v235_v33  ;;  %v238_v37 = vadd.f32 %v384_v31, %v237_v35  ;;  %v449_v38 = vpop.f32.mrb[3].mxu1  ;;  %vm241_vm4 = vcmp.gt.f32.partialorder %v235_v33, 0.0 }
 0x1e0   :  { %vm242_vm5 = vcmp.gt.f32.partialorder %v238_v37, 0.0  ;;  %v244_v39 = vmul.f32 0.2, %v238_v37  ;;  %v245_v40 = vsel %vm241_vm4, %v235_v33, %v243_v36 }
 0x1e2   :  { %v246_v41 = vsel %vm242_vm5, %v238_v37, %v244_v39 }
 0x1e3   :  { %v247_v42 = vpack.c.bf16 %v246_v41, %v245_v40 }
 0x1e5   :  { %467 = vmatmul.mubr.bf16.vlgmr.msra.gmra.mrb[4].mxu0 %v247_v42 }
 0x2b8   :  { %v353_v44 = vpop.f32.mrb[4].mxu0 }
 0x2b9   :  { %v354_v45 = vadd.f32 %v393_v43, %v353_v44  ;;  %v468_v46 = vpop.f32.mrb[5].mxu0 }
 0x2ba   :  { %v356_v47 = vpop.f32.mrb[6].mxu0 }
 0x2bb   :  { %v402_v48 = vmul.f32 -1.442695, %v354_v45  ;;  %v357_v49 = vadd.f32 %v393_v43, %v356_v47  ;;  %v469_v50 = vpop.f32.mrb[7].mxu0 }
 0x2bd   :  { %494 = vpow2.f32 %v402_v48  ;;  %v403_v51 = vmul.f32 -1.442695, %v357_v49 }
 0x2bf   :  { %496 = vpow2.f32 %v403_v51 }
 0x2c7   :  { %v495_v52 = vpop.eup %494 }
 0x2c8   :  { %v366_v53 = vadd.f32 1.0, %v495_v52 }
 0x2c9   :  { %v497_v54 = vpop.eup %496 }
 0x2ca   :  { %498 = vrcp.f32 %v366_v53  ;;  %v367_v55 = vadd.f32 1.0, %v497_v54 }
 0x2cc   :  { %500 = vrcp.f32 %v367_v55 }
 0x2d4   :  { %v499_v56 = vpop.eup %498 }
 0x2d5   :  { %372 = vst [vmem:[%s668_s7] sm:$0xff] %v499_v56 }
 0x2d6   :  { %v501_v57 = vpop.eup %500 }
 0x2d7   :  { %373 = vst [vmem:[%s668_s7 + $0x8] sm:$0xff] %v501_v57 }
 0x2d8   :  { %378 = vsyncpa [#allocation3], 1 }
 0x2d9   :  { %379 = vsyncpa [#allocation5], 1 }

// kernel: decoder_forward_prepared.1
= control target key start
LH: loop header
LB: loop body
LE: loop exit
PB: predicated region body
PF: predicated region fallthrough
CT: control target
= control target key end

     0   :  { %12 = vsyncpa [#allocation3], 0  ;;  %s661_s0 = inlined_call_operand.vmem [shape: bf16[16,16], index: 0, kind: input, shape index: {}]   ;;  %s662_s1 = inlined_call_operand.vmem [shape: bf16[16,128], index: 1, kind: input, shape index: {}]   ;;  %s663_s2 = inlined_call_operand.vmem [shape: f32[1,128], index: 2, kind: input, shape index: {}]   ;;  %s664_s3 = inlined_call_operand.hbm [shape: bf16[128,128], index: 3, kind: input, shape index: {}]   ;;  %s665_s4 = inlined_call_operand.vmem [shape: f32[1,128], index: 4, kind: input, shape index: {}]   ;;  %s666_s5 = inlined_call_operand.hbm [shape: bf16[128,128], index: 5, kind: input, shape index: {}]   ;;  %s667_s6 = inlined_call_operand.vmem [shape: f32[1,128], index: 6, kind: input, shape index: {}]   ;;  %s668_s7 = inlined_call_operand.vmem [shape: f32[16,128], index: 7, kind: output, shape index: {}]  }
   0x1   :  { %13 = vsyncpa [#allocation5], 0  ;;  %s550_s24 = smov [#allocation2]   ;;  %s502_s28 = scalar_lea.hbm %s664_s3, 1024 }
   0x2   :  { %s25_s25 = sshll.u32 %s550_s24, 4  ;;  %p503_p0 = scmp.ne.s32.totalorder %s664_s3, %s502_s28  ;;  %s26_s25 = int_to_ptr.vmem [resolvable:$true] %s25_s25 }
   0x3   :  { %p506_p1 = scmp.lt.u32.totalorder %s502_s28, %s664_s3 }
   0x5   :  { %p508_p2 = pnand %p506_p1, %p503_p0 }
   0x7   :  { %511 = shalt.err (!%p508_p2)
}
   0x8   :  { %s512_s10 = scalar_lea.vmem %s26_s25, 1024  ;;  %p517_p4 = scmp.lt.s32.totalorder %s26_s25, %s26_s25 }
   0x9   :  { %p513_p3 = scmp.ne.s32.totalorder %s26_s25, %s512_s10  ;;  %p518_p5 = scmp.lt.s32.totalorder %s512_s10, %s512_s10 }
   0xb   :  { %p519_p6 = por %p518_p5, %p517_p4 }
   0xd   :  { %p520_p7 = pnand %p519_p6, %p513_p3 }
   0xf   :  { %523 = shalt.err (!%p520_p7)
}
  0x10   :  { %s551_s11 = smov 64   ;;  %s552_s12 = smov 4  }
  0x11   :  { %31 = dma.hbm_to_vmem [thread:$0]  %s664_s3, 1024, %s26_s25, [#allocation3], %s551_s11, %s551_s11, %s552_s12  }
  0x12   :  { %s553_s15 = smov [#allocation4]   ;;  %s524_s19 = scalar_lea.hbm %s666_s5, 1024 }
  0x13   :  { %s39_s16 = sshll.u32 %s553_s15, 4  ;;  %p525_p8 = scmp.ne.s32.totalorder %s666_s5, %s524_s19  ;;  %s40_s16 = int_to_ptr.vmem [resolvable:$true] %s39_s16 }
  0x14   :  { %p528_p9 = scmp.lt.u32.totalorder %s524_s19, %s666_s5 }
  0x16   :  { %p530_p10 = pnand %p528_p9, %p525_p8 }
  0x18   :  { %533 = shalt.err (!%p530_p10)
}
  0x19   :  { %s534_s24 = scalar_lea.vmem %s40_s16, 1024  ;;  %p539_p12 = scmp.lt.s32.totalorder %s40_s16, %s40_s16 }
  0x1a   :  { %p535_p11 = scmp.ne.s32.totalorder %s40_s16, %s534_s24  ;;  %p540_p13 = scmp.lt.s32.totalorder %s534_s24, %s534_s24 }
  0x1c   :  { %p541_p0 = por %p540_p13, %p539_p12 }
  0x1e   :  { %p542_p1 = pnand %p541_p0, %p535_p11 }
  0x20   :  { %545 = shalt.err (!%p542_p1)
}
  0x21   :  { %45 = dma.hbm_to_vmem [thread:$0]  %s666_s5, 1024, %s40_s16, [#allocation5], %s551_s11, %s551_s11, %s552_s12  }
  0x22   :  { %546 = dma.done.wait [#allocation3], 1024  }
  0x23   :  { %547 = vsyncadd [#allocation3], 4294966272 }
  0x24   :  { %548 = dma.done.wait [#allocation5], 1024  }
  0x25   :  { %549 = vsyncadd [#allocation5], 4294966272  ;;  %v554_v0 = vmov 0.0   ;;  %vm555_vm0 = vmmov 0   ;;  %v476_v1 = vld [vmem:[%s662_s1] sm:$0xff]   ;;  %vm77_vm1 = vcmask 130048  }
  0x26   :  { %424 = vmatprep.subr.bf16.mxu0 %v554_v0  ;;  %426 = vmatprep.mubr.msk.bf16.mxu0 %vm555_vm0, %v554_v0  ;;  %v477_v2 = vld [vmem:[%s661_s0] sm:$0xff]   ;;  %v479_v4 = vld [vmem:[#allocation2 + $0x8] sm:$0xff]   ;;  %v480_v5 = vld [vmem:[#allocation2 + $0x10] sm:$0xff]  }
  0x27   :  { %430 = vmatprep.subr.bf16.mxu1 %v554_v0  ;;  %446 = vmatprep.mubr.msk.bf16.mxu1 %vm555_vm0, %v554_v0  ;;  %v478_v3 = vld [vmem:[#allocation2] sm:$0xff]   ;;  %v481_v6 = vld [vmem:[#allocation2 + $0x18] sm:$0xff]   ;;  %v483_v8 = vld [vmem:[#allocation2 + $0x28] sm:$0xff]  }
  0x28   :  { %425 = vmatpush3.bf16.msra.mxu0 %v476_v1  ;;  %431 = vmatpush3.bf16.msra.mxu1 %v478_v3  ;;  %v482_v7 = vld [vmem:[#allocation2 + $0x20] sm:$0xff]   ;;  %v484_v9 = vld [vmem:[#allocation2 + $0x30] sm:$0xff]   ;;  %v485_v10 = vld [vmem:[#allocation2 + $0x38] sm:$0xff]  }
  0x29   :  { %450 = vmatprep.subr.bf16.mxu0 %v554_v0  ;;  %432 = vmatprep.subr.bf16.mxu1 %v554_v0  ;;  %v486_v11 = vld [vmem:[#allocation4] sm:$0xff]   ;;  %v487_v12 = vld [vmem:[#allocation4 + $0x8] sm:$0xff]   ;;  %v488_v13 = vld [vmem:[#allocation4 + $0x10] sm:$0xff]  }
  0x2a   :  { %v489_v14 = vld [vmem:[#allocation4 + $0x18] sm:$0xff]   ;;  %v490_v15 = vld [vmem:[#allocation4 + $0x20] sm:$0xff]   ;;  %v491_v16 = vld [vmem:[#allocation4 + $0x28] sm:$0xff]  }
  0x2b   :  { %427 = vmatmul.mubr.msk.bf16.vlgmr.msra.gmra.mrb[0].mxu0 %vm77_vm1, %v477_v2  ;;  %v380_v17 = vld [vmem:[%s663_s2] ss:$0 sm:$0xff]  ;;  %v492_v29 = vld [vmem:[#allocation4 + $0x30] sm:$0xff]   ;;  %v493_v30 = vld [vmem:[#allocation4 + $0x38] sm:$0xff]  }
  0x2c   :  { %466 = vmatprep.mubr.msk.bf16.mxu0 %vm555_vm0, %v554_v0  ;;  %433 = vmatpush3.bf16.msra.mxu1 %v479_v4  ;;  %v384_v31 = vld [vmem:[%s665_s4] ss:$0 sm:$0xff] }
  0x2d   :  { %434 = vmatprep.subr.bf16.mxu1 %v554_v0  ;;  %451 = vmatpush3.bf16.msra.mxu0 %v486_v11  ;;  %v393_v43 = vld [vmem:[%s667_s6] ss:$0 sm:$0xff] }
  0x2e   :  { %452 = vmatprep.subr.bf16.mxu0 %v554_v0 }
  0x30   :  { %435 = vmatpush3.bf16.msra.mxu1 %v480_v5 }
  0x31   :  { %436 = vmatprep.subr.bf16.mxu1 %v554_v0  ;;  %453 = vmatpush3.bf16.msra.mxu0 %v487_v12 }
  0x32   :  { %454 = vmatprep.subr.bf16.mxu0 %v554_v0 }
  0x34   :  { %437 = vmatpush3.bf16.msra.mxu1 %v481_v6 }
  0x35   :  { %438 = vmatprep.subr.bf16.mxu1 %v554_v0  ;;  %455 = vmatpush3.bf16.msra.mxu0 %v488_v13 }
  0x36   :  { %456 = vmatprep.subr.bf16.mxu0 %v554_v0 }
  0x38   :  { %439 = vmatpush3.bf16.msra.mxu1 %v482_v7 }
  0x39   :  { %440 = vmatprep.subr.bf16.mxu1 %v554_v0  ;;  %457 = vmatpush3.bf16.msra.mxu0 %v489_v14 }
  0x3a   :  { %458 = vmatprep.subr.bf16.mxu0 %v554_v0 }
  0x3c   :  { %441 = vmatpush3.bf16.msra.mxu1 %v483_v8 }
  0x3d   :  { %442 = vmatprep.subr.bf16.mxu1 %v554_v0  ;;  %459 = vmatpush3.bf16.msra.mxu0 %v490_v15 }
  0x3e   :  { %460 = vmatprep.subr.bf16.mxu0 %v554_v0 }
  0x40   :  { %443 = vmatpush3.bf16.msra.mxu1 %v484_v9 }
  0x41   :  { %444 = vmatprep.subr.bf16.mxu1 %v554_v0  ;;  %461 = vmatpush3.bf16.msra.mxu0 %v491_v16 }
  0x42   :  { %462 = vmatprep.subr.bf16.mxu0 %v554_v0 }
  0x44   :  { %445 = vmatpush3.bf16.msra.mxu1 %v485_v10 }
  0x45   :  { %463 = vmatpush3.bf16.msra.mxu0 %v492_v29 }
  0x46   :  { %464 = vmatprep.subr.bf16.mxu0 %v554_v0 }
  0x49   :  { %465 = vmatpush3.bf16.msra.mxu0 %v493_v30 }
  0xfe   :  { %v115_v18 = vpop.f32.mrb[0].mxu0 }
  0xff   :  { %v116_v19 = vadd.f32 %v380_v17, %v115_v18  ;;  %v428_v20 = vpop.f32.mrb[1].mxu0 }
 0x100   :  { %v118_v21 = vpop.f32.mrb[2].mxu0 }
 0x101   :  { %v124_v22 = vmul.f32 0.2, %v116_v19  ;;  %v119_v23 = vadd.f32 %v380_v17, %v118_v21  ;;  %v429_v24 = vpop.f32.mrb[3].mxu0  ;;  %vm122_vm2 = vcmp.gt.f32.partialorder %v116_v19, 0.0 }
 0x103   :  { %vm123_vm3 = vcmp.gt.f32.partialorder %v119_v23, 0.0  ;;  %v125_v25 = vmul.f32 0.2, %v119_v23  ;;  %v126_v26 = vsel %vm122_vm2, %v116_v19, %v124_v22 }
 0x105   :  { %v127_v27 = vsel %vm123_vm3, %v119_v23, %v125_v25 }
 0x106   :  { %v128_v28 = vpack.c.bf16 %v127_v27, %v126_v26 }
 0x108   :  { %447 = vmatmul.mubr.bf16.vlgmr.msra.gmra.mrb[0].mxu1 %v128_v28 }
 0x1db   :  { %v234_v32 = vpop.f32.mrb[0].mxu1 }
 0x1dc   :  { %v235_v33 = vadd.f32 %v384_v31, %v234_v32  ;;  %v448_v34 = vpop.f32.mrb[1].mxu1 }
 0x1dd   :  { %v237_v35 = vpop.f32.mrb[2].mxu1 }
 0x1de   :  { %v243_v36 = vmul.f32 0.2, %v235_v33  ;;  %v238_v37 = vadd.f32 %v384_v31, %v237_v35  ;;  %v449_v38 = vpop.f32.mrb[3].mxu1  ;;  %vm241_vm4 = vcmp.gt.f32.partialorder %v235_v33, 0.0 }
 0x1e0   :  { %vm242_vm5 = vcmp.gt.f32.partialorder %v238_v37, 0.0  ;;  %v244_v39 = vmul.f32 0.2, %v238_v37  ;;  %v245_v40 = vsel %vm241_vm4, %v235_v33, %v243_v36 }
 0x1e2   :  { %v246_v41 = vsel %vm242_vm5, %v238_v37, %v244_v39 }
 0x1e3   :  { %v247_v42 = vpack.c.bf16 %v246_v41, %v245_v40 }
 0x1e5   :  { %467 = vmatmul.mubr.bf16.vlgmr.msra.gmra.mrb[4].mxu0 %v247_v42 }
 0x2b8   :  { %v353_v44 = vpop.f32.mrb[4].mxu0 }
 0x2b9   :  { %v354_v45 = vadd.f32 %v393_v43, %v353_v44  ;;  %v468_v46 = vpop.f32.mrb[5].mxu0 }
 0x2ba   :  { %v356_v47 = vpop.f32.mrb[6].mxu0 }
 0x2bb   :  { %v402_v48 = vmul.f32 -1.442695, %v354_v45  ;;  %v357_v49 = vadd.f32 %v393_v43, %v356_v47  ;;  %v469_v50 = vpop.f32.mrb[7].mxu0 }
 0x2bd   :  { %494 = vpow2.f32 %v402_v48  ;;  %v403_v51 = vmul.f32 -1.442695, %v357_v49 }
 0x2bf   :  { %496 = vpow2.f32 %v403_v51 }
 0x2c7   :  { %v495_v52 = vpop.eup %494 }
 0x2c8   :  { %v366_v53 = vadd.f32 1.0, %v495_v52 }
 0x2c9   :  { %v497_v54 = vpop.eup %496 }
 0x2ca   :  { %498 = vrcp.f32 %v366_v53  ;;  %v367_v55 = vadd.f32 1.0, %v497_v54 }
 0x2cc   :  { %500 = vrcp.f32 %v367_v55 }
 0x2d4   :  { %v499_v56 = vpop.eup %498 }
 0x2d5   :  { %372 = vst [vmem:[%s668_s7] sm:$0xff] %v499_v56 }
 0x2d6   :  { %v501_v57 = vpop.eup %500 }
 0x2d7   :  { %373 = vst [vmem:[%s668_s7 + $0x8] sm:$0xff] %v501_v57 }
 0x2d8   :  { %378 = vsyncpa [#allocation3], 1 }
 0x2d9   :  { %379 = vsyncpa [#allocation5], 1 }

</bundles_post_ra>
